<compile_context>
chip_gen: v5e
topology: v5e:2x2
jax: 0.10.0
libtpu: 0.0.40
codegen_flags: <defaults>
</compile_context>

<pallas_src>
import jax
import jax.numpy as jnp
from jax.experimental import pallas as pl
from jax.experimental.pallas import tpu as pltpu


_LANES = 128
_NEG_INF = -1e30  # padded-expert bias: exp() underflows to exactly 0 in f32


def _round_up(x, m):
    return ((x + m - 1) // m) * m


def _sublane_multiple(dtype):
    # Minimum second-minor tile: 8 rows for 4-byte, 16 for 2-byte, 32 for 1-byte
    # dtypes (sub-32-bit types pack along sublanes).
    return max(8, 32 // jnp.dtype(dtype).itemsize)


def _vmem_budget_bytes():
    # Generation-aware VMEM budget: 128 MiB physical on v5e/v6e -> ~96 MiB usable,
    # 64 MiB on v7x -> 48 MiB. The ~25% headroom covers Mosaic internal scratch,
    # semaphores and the double-buffer fallback for the resident weight.
    cap = 64 << 20  # conservative default (v7x-sized) if the query is unavailable
    try:
        info = pltpu.get_tpu_info()
        cap = int(getattr(info, "vmem_capacity_bytes", cap) or cap)
    except Exception:
        pass
    return min((cap * 3) // 4, 112 << 20)


def _choose_tiles(batch_eff, d_pad, e_pad, x_itemsize, out_itemsize, sub, budget,
                  tb_cap=None):
    """Pick (tb, tk, kt): batch-tile rows, K-tile width, number of K grid steps.

    Preference: keep the whole weight VMEM-resident (kt == 1 -> W is read from
    HBM exactly once) and spend the remaining budget on the largest batch tile,
    because K-splitting re-reads W once per batch tile. Only split K when even a
    minimal (one-sublane-group) batch tile would not fit next to the weight
    chunk (huge input_dim on v7x's 64 MiB VMEM).
    """
    if tb_cap is None:
        tb_cap = 4096
    tb_cap = max(sub, (min(tb_cap, batch_eff) // sub) * sub)

    n128 = d_pad // _LANES
    for kt in range(1, n128 + 1):
        if n128 % kt:
            continue  # tk must divide d_pad evenly -> no partial K block ever
        tk = (n128 // kt) * _LANES
        # Budget W / bias as double-buffered (worst case) so the pipeline still
        # fits even if single-buffering of the resident weight is unavailable.
        fixed = 2 * tk * e_pad * x_itemsize + 2 * 8 * e_pad * 4
        per_row = (2 * tk * x_itemsize          # double-buffered x tile
                   + 2 * e_pad * out_itemsize   # double-buffered output tile
                   + e_pad * 4)                 # f32 accumulator scratch
        avail = budget - fixed
        if avail < per_row * sub:
            continue                            # weight chunk too big: split K more
        tb = min((avail // per_row) // sub * sub, tb_cap)
        return tb, tk, kt
    # Degenerate fallback (enormous num_experts): smallest legal tiles.
    return sub, _LANES, n128


def gating_kernel(x_ref, w_ref, b_ref, o_ref, acc_ref):
    """One (batch-tile i, K-tile k) grid step of softmax(x @ W + b, axis=-1)."""
    k = pl.program_id(1)

    @pl.when(k == 0)
    def _():
        acc_ref[...] = jnp.zeros_like(acc_ref)

    # Linear-layer partial product on the MXU; f32 accumulation in VMEM scratch.
    acc_ref[...] += jnp.dot(x_ref[...], w_ref[...],
                            preferred_element_type=jnp.float32)

    @pl.when(k == pl.num_programs(1) - 1)
    def _():
        logits = acc_ref[...] + b_ref[...]          # bias broadcast over rows
        # Numerically-stable softmax over the lane-padded expert axis; padded
        # expert columns carry a -1e30 bias, so exp() underflows to exactly 0.
        m = jnp.max(logits, axis=-1, keepdims=True)
        e = jnp.exp(logits - m)
        denom = jnp.sum(e, axis=-1, keepdims=True)
        o_ref[...] = (e * pl.reciprocal(denom, approx=False)).astype(o_ref.dtype)


def gating_network(x, w, b, *, block_batch=None):
    """softmax(x @ w + b, axis=-1) — MoE gating — via a Pallas TPU kernel.

    x: [batch, input_dim]          (consumed in its own dtype; never cast here)
    w: [input_dim, num_experts]    (nn.Linear weight stored transposed)
    b: [num_experts] or [1, num_experts]
    block_batch: optional cap on the batch tile (rows); default auto from VMEM.
    """
    batch, input_dim = x.shape
    num_experts = w.shape[1]
    out_dtype = x.dtype
    x_itemsize = jnp.dtype(x.dtype).itemsize
    sub = _sublane_multiple(x.dtype)

    d_pad = _round_up(input_dim, _LANES)
    e_pad = _round_up(num_experts, _LANES)

    # Only copy x when strictly necessary (a padded copy is a full extra HBM
    # read+write of the dominant operand): feature padding when input_dim is not
    # a lane multiple; batch padding only when batch < one sublane group (tiny).
    batch_eff = batch if batch >= sub else sub
    budget = _vmem_budget_bytes()
    tb, tk, kt = _choose_tiles(batch_eff, d_pad, e_pad, x_itemsize,
                               jnp.dtype(out_dtype).itemsize, sub, budget,
                               tb_cap=block_batch)

    if d_pad != input_dim or batch_eff != batch:
        x_in = jnp.zeros((batch_eff, d_pad), x.dtype).at[:batch, :input_dim].set(x)
    else:
        x_in = x                                   # fast path: no extra pass over x

    # Weight / bias are small; pad and cast them in the wrapper.
    if (d_pad, e_pad) != (input_dim, num_experts) or w.dtype != x.dtype:
        w_in = jnp.zeros((d_pad, e_pad), x.dtype).at[:input_dim, :num_experts].set(
            w.astype(x.dtype))
    else:
        w_in = w
    b_in = jnp.full((1, e_pad), _NEG_INF, jnp.float32).at[:, :num_experts].set(
        jnp.reshape(b, (1, num_experts)).astype(jnp.float32))

    grid = (pl.cdiv(batch_eff, tb), kt)

    def _call(single_buffer_resident):
        def resident(shape, index_map):
            # Constant-index blocks (resident weight / bias) don't need a second
            # pipeline buffer; the reclaimed VMEM goes to a larger x tile.
            if single_buffer_resident:
                return pl.BlockSpec(shape, index_map, pipeline_mode=pl.Buffered(1))
            return pl.BlockSpec(shape, index_map)

        w_spec = (resident((tk, e_pad), lambda i, k: (k, 0)) if kt == 1
                  else pl.BlockSpec((tk, e_pad), lambda i, k: (k, 0)))
        return pl.pallas_call(
            gating_kernel,
            out_shape=jax.ShapeDtypeStruct((batch_eff, e_pad), out_dtype),
            grid_spec=pltpu.PrefetchScalarGridSpec(
                num_scalar_prefetch=0,
                grid=grid,
                in_specs=[
                    pl.BlockSpec((tb, tk), lambda i, k: (i, k)),   # x: streamed
                    w_spec,                                        # W: resident / K-streamed
                    resident((1, e_pad), lambda i, k: (0, 0)),     # bias: resident
                ],
                out_specs=pl.BlockSpec((tb, e_pad), lambda i, k: (i, 0)),
                scratch_shapes=[pltpu.VMEM((tb, e_pad), jnp.float32)],
            ),
            compiler_params=pltpu.CompilerParams(
                # Batch tiles are independent ("parallel" -> megacore/2-TC split);
                # the K axis accumulates into VMEM scratch ("arbitrary").
                dimension_semantics=("parallel", "arbitrary"),
                vmem_limit_bytes=int(budget),
            ),
        )(x_in, w_in, b_in)

    try:
        out = _call(True)
    except Exception:
        # jax versions without BlockSpec.pipeline_mode: plain double-buffered
        # specs (the VMEM budget above already accounts for this).
        out = _call(False)

    return out[:batch, :num_experts]


if __name__ == "__main__":
    key = jax.random.PRNGKey(0)
    input_dim, num_experts = 32, 4
    kx, kw, kb = jax.random.split(key, 3)

    # nn.Linear(input_dim, num_experts): weight [E, D] stored transposed as [D, E].
    bound = 1.0 / (input_dim ** 0.5)
    w = jax.random.uniform(kw, (input_dim, num_experts), jnp.float32, -bound, bound)
    b = jax.random.uniform(kb, (num_experts,), jnp.float32, -bound, bound)

    def ref_fn(xv, wv, bv):
        return jax.nn.softmax(
            xv.astype(jnp.float32) @ wv.astype(jnp.float32) + bv.astype(jnp.float32),
            axis=-1)

    # 1) Small f32 case (feature dim needs lane padding), single batch tile.
    x = jax.random.normal(kx, (8, input_dim), jnp.float32)
    out = gating_network(x, w, b)
    jax.block_until_ready(out)
    assert out.shape == (8, num_experts) and out.dtype == x.dtype
    assert jnp.allclose(out, ref_fn(x, w, b), atol=1e-5, rtol=1e-5)
    assert jnp.allclose(jnp.sum(out, axis=-1), 1.0, atol=1e-5)

    # 2) Multi-tile batch grid (grid=(3, 1)).
    x2 = jax.random.normal(jax.random.PRNGKey(1), (24, input_dim), jnp.float32)
    out2 = gating_network(x2, w, b, block_batch=8)
    jax.block_until_ready(out2)
    assert out2.shape == (24, num_experts)
    assert jnp.allclose(out2, ref_fn(x2, w, b), atol=1e-5, rtol=1e-5)

    # 3) Lane-aligned feature dim + ragged batch: x passes straight through with
    #    NO padded copy; the trailing partial batch tile exercises masked writes.
    d3 = 256
    w3 = jax.random.uniform(jax.random.PRNGKey(2), (d3, num_experts), jnp.float32,
                            -bound, bound)
    x3 = jax.random.normal(jax.random.PRNGKey(3), (20, d3), jnp.float32)
    out3 = gating_network(x3, w3, b, block_batch=16)
    jax.block_until_ready(out3)
    assert out3.shape == (20, num_experts)
    assert jnp.allclose(out3, ref_fn(x3, w3, b), atol=1e-4, rtol=1e-4)
    assert jnp.allclose(jnp.sum(out3, axis=-1), 1.0, atol=1e-5)

    # 4) Native-bf16 activations (no wrapper cast): bf16 in / bf16 out, f32
    #    accumulation + softmax inside the kernel.
    x_bf = x.astype(jnp.bfloat16)
    out_bf = gating_network(x_bf, w.astype(jnp.bfloat16), b)
    jax.block_until_ready(out_bf)
    assert out_bf.dtype == jnp.bfloat16 and out_bf.shape == (8, num_experts)
    assert jnp.allclose(out_bf.astype(jnp.float32), ref_fn(x_bf, w, b), atol=2e-2)
    assert jnp.allclose(jnp.sum(out_bf.astype(jnp.float32), axis=-1), 1.0, atol=2e-2)

    print("KERNEL_OK")
</pallas_src>

<mosaic_0001>
module attributes {stable_mosaic.version = 11 : i64} {
  func.func @gating_kernel(%arg0: i32, %arg1: i32, %arg2: memref<8x128xf32, #tpu.memory_space<vmem>>, %arg3: memref<128x128xf32, #tpu.memory_space<vmem>>, %arg4: memref<1x128xf32, #tpu.memory_space<vmem>>, %arg5: memref<8x128xf32, #tpu.memory_space<vmem>>, %arg6: memref<8x128xf32, #tpu.memory_space<vmem>>) attributes {dimension_semantics = [#tpu.dimension_semantics<parallel>, #tpu.dimension_semantics<arbitrary>], iteration_bounds = array<i64: 1, 1>, scalar_prefetch = 0 : i64, scratch_operands = 1 : i64, tpu.core_type = #tpu.core_type<tc>, window_params = [{transform_indices = @transform_0, window_bounds = array<i64: 8, 128>}, {pipeline_mode = #tpu.pipeline_mode<synchronous>, transform_indices = @transform_1, window_bounds = array<i64: 128, 128>}, {pipeline_mode = #tpu.pipeline_mode<synchronous>, transform_indices = @transform_2, window_bounds = array<i64: 1, 128>}, {transform_indices = @transform_3, window_bounds = array<i64: 8, 128>}]} {
    %c0_i32 = arith.constant 0 : i32
    %0 = arith.cmpi eq, %arg1, %c0_i32 : i32
    %1 = arith.extui %0 : i1 to i32
    %c0_i32_0 = arith.constant 0 : i32
    %2 = arith.cmpi ne, %1, %c0_i32_0 : i32
    scf.if %2 {
      %cst_10 = arith.constant 0.000000e+00 : f32
      %12 = vector.broadcast %cst_10 : f32 to vector<8x128xf32>
      %c0_11 = arith.constant 0 : index
      %c0_12 = arith.constant 0 : index
      %13 = vector.load %arg6[%c0_11, %c0_12] : memref<8x128xf32, #tpu.memory_space<vmem>>, vector<8x128xf32>
      tpu.vector_store %arg6[%c0_11, %c0_12], %12 {strides = array<i32>} : memref<8x128xf32, #tpu.memory_space<vmem>>, vector<8x128xf32>,
    } else {
    }
    %c0 = arith.constant 0 : index
    %c0_1 = arith.constant 0 : index
    %3 = vector.load %arg6[%c0, %c0_1] : memref<8x128xf32, #tpu.memory_space<vmem>>, vector<8x128xf32>
    %c0_2 = arith.constant 0 : index
    %c0_3 = arith.constant 0 : index
    %4 = vector.load %arg2[%c0_2, %c0_3] : memref<8x128xf32, #tpu.memory_space<vmem>>, vector<8x128xf32>
    %c0_4 = arith.constant 0 : index
    %c0_5 = arith.constant 0 : index
    %5 = vector.load %arg3[%c0_4, %c0_5] : memref<128x128xf32, #tpu.memory_space<vmem>>, vector<128x128xf32>
    %cst = arith.constant dense<0.000000e+00> : vector<8x128xf32>
    %6 = tpu.matmul %4, %5, %cst {dimension_numbers = #tpu.dot_dimension_numbers<[1], [0], [0], [1], [0, 0, 1, 1], [], []>} : vector<8x128xf32>, vector<128x128xf32>, vector<8x128xf32> -> vector<8x128xf32>
    %7 = arith.addf %3, %6 : vector<8x128xf32>
    %c0_6 = arith.constant 0 : index
    %c0_7 = arith.constant 0 : index
    %8 = vector.load %arg6[%c0_6, %c0_7] : memref<8x128xf32, #tpu.memory_space<vmem>>, vector<8x128xf32>
    tpu.vector_store %arg6[%c0_6, %c0_7], %7 {strides = array<i32>} : memref<8x128xf32, #tpu.memory_space<vmem>>, vector<8x128xf32>,
    %c0_i32_8 = arith.constant 0 : i32
    %9 = arith.cmpi eq, %arg1, %c0_i32_8 : i32
    %10 = arith.extui %9 : i1 to i32
    %c0_i32_9 = arith.constant 0 : i32
    %11 = arith.cmpi ne, %10, %c0_i32_9 : i32
    scf.if %11 {
      %c0_10 = arith.constant 0 : index
      %c0_11 = arith.constant 0 : index
      %12 = vector.load %arg6[%c0_10, %c0_11] : memref<8x128xf32, #tpu.memory_space<vmem>>, vector<8x128xf32>
      %c0_12 = arith.constant 0 : index
      %c0_13 = arith.constant 0 : index
      %13 = vector.load %arg4[%c0_12, %c0_13] : memref<1x128xf32, #tpu.memory_space<vmem>>, vector<1x128xf32>
      %14 = vector.broadcast %13 : vector<1x128xf32> to vector<8x128xf32>
      %15 = arith.addf %12, %14 : vector<8x128xf32>
      %cst_14 = arith.constant dense<0xFF800000> : vector<8xf32>
      %16 = vector.multi_reduction <maximumf>, %15, %cst_14 [1] : vector<8x128xf32> to vector<8xf32>
      %17 = vector.shape_cast %16 : vector<8xf32> to vector<8x1xf32>
      %18 = vector.broadcast %17 : vector<8x1xf32> to vector<8x128xf32>
      %19 = arith.subf %15, %18 : vector<8x128xf32>
      %20 = math.exp %19 : vector<8x128xf32>
      %cst_15 = arith.constant dense<0.000000e+00> : vector<8xf32>
      %21 = vector.multi_reduction <add>, %20, %cst_15 [1] : vector<8x128xf32> to vector<8xf32>
      %22 = vector.shape_cast %21 : vector<8xf32> to vector<8x1xf32>
      %23 = tpu.reciprocal %22 : vector<8x1xf32> -> vector<8x1xf32>
      %24 = vector.broadcast %23 : vector<8x1xf32> to vector<8x128xf32>
      %25 = arith.mulf %20, %24 : vector<8x128xf32>
      %c0_16 = arith.constant 0 : index
      %c0_17 = arith.constant 0 : index
      %26 = vector.load %arg5[%c0_16, %c0_17] : memref<8x128xf32, #tpu.memory_space<vmem>>, vector<8x128xf32>
      tpu.vector_store %arg5[%c0_16, %c0_17], %25 {strides = array<i32>} : memref<8x128xf32, #tpu.memory_space<vmem>>, vector<8x128xf32>,
    } else {
    }
    return
  }
  func.func @transform_0(%arg0: i32, %arg1: i32) -> (i32, i32) {
    %c0_i32 = arith.constant 0 : i32
    return %arg0, %arg1 : i32, i32
  }
  func.func @transform_1(%arg0: i32, %arg1: i32) -> (i32, i32) {
    %c0_i32 = arith.constant 0 : i32
    %c0_i32_0 = arith.constant 0 : i32
    return %arg1, %c0_i32 : i32, i32
  }
  func.func @transform_2(%arg0: i32, %arg1: i32) -> (i32, i32) {
    %c0_i32 = arith.constant 0 : i32
    %c0_i32_0 = arith.constant 0 : i32
    %c0_i32_1 = arith.constant 0 : i32
    return %c0_i32, %c0_i32_0 : i32, i32
  }
  func.func @transform_3(%arg0: i32, %arg1: i32) -> (i32, i32) {
    %c0_i32 = arith.constant 0 : i32
    %c0_i32_0 = arith.constant 0 : i32
    return %arg0, %c0_i32 : i32, i32
  }
}

module attributes {stable_mosaic.version = 11 : i64} {
  func.func @gating_kernel(%arg0: i32, %arg1: i32, %arg2: memref<8x128xf32, #tpu.memory_space<vmem>>, %arg3: memref<128x128xf32, #tpu.memory_space<vmem>>, %arg4: memref<1x128xf32, #tpu.memory_space<vmem>>, %arg5: memref<8x128xf32, #tpu.memory_space<vmem>>, %arg6: memref<8x128xf32, #tpu.memory_space<vmem>>) attributes {dimension_semantics = [#tpu.dimension_semantics<parallel>, #tpu.dimension_semantics<arbitrary>], iteration_bounds = array<i64: 1, 1>, scalar_prefetch = 0 : i64, scratch_operands = 1 : i64, tpu.core_type = #tpu.core_type<tc>, window_params = [{transform_indices = @transform_0, window_bounds = array<i64: 8, 128>}, {transform_indices = @transform_1, window_bounds = array<i64: 128, 128>}, {pipeline_mode = #tpu.pipeline_mode<synchronous>, transform_indices = @transform_2, window_bounds = array<i64: 1, 128>}, {transform_indices = @transform_3, window_bounds = array<i64: 8, 128>}]} {
    %c0_i32 = arith.constant 0 : i32
    %0 = arith.cmpi eq, %arg1, %c0_i32 : i32
    %1 = arith.extui %0 : i1 to i32
    %c0_i32_0 = arith.constant 0 : i32
    %2 = arith.cmpi ne, %1, %c0_i32_0 : i32
    scf.if %2 {
      %cst_10 = arith.constant 0.000000e+00 : f32
      %12 = vector.broadcast %cst_10 : f32 to vector<8x128xf32>
      %c0_11 = arith.constant 0 : index
      %c0_12 = arith.constant 0 : index
      %13 = vector.load %arg6[%c0_11, %c0_12] : memref<8x128xf32, #tpu.memory_space<vmem>>, vector<8x128xf32>
      tpu.vector_store %arg6[%c0_11, %c0_12], %12 {strides = array<i32>} : memref<8x128xf32, #tpu.memory_space<vmem>>, vector<8x128xf32>,
    } else {
    }
    %c0 = arith.constant 0 : index
    %c0_1 = arith.constant 0 : index
    %3 = vector.load %arg6[%c0, %c0_1] : memref<8x128xf32, #tpu.memory_space<vmem>>, vector<8x128xf32>
    %c0_2 = arith.constant 0 : index
    %c0_3 = arith.constant 0 : index
    %4 = vector.load %arg2[%c0_2, %c0_3] : memref<8x128xf32, #tpu.memory_space<vmem>>, vector<8x128xf32>
    %c0_4 = arith.constant 0 : index
    %c0_5 = arith.constant 0 : index
    %5 = vector.load %arg3[%c0_4, %c0_5] : memref<128x128xf32, #tpu.memory_space<vmem>>, vector<128x128xf32>
    %cst = arith.constant dense<0.000000e+00> : vector<8x128xf32>
    %6 = tpu.matmul %4, %5, %cst {dimension_numbers = #tpu.dot_dimension_numbers<[1], [0], [0], [1], [0, 0, 1, 1], [], []>} : vector<8x128xf32>, vector<128x128xf32>, vector<8x128xf32> -> vector<8x128xf32>
    %7 = arith.addf %3, %6 : vector<8x128xf32>
    %c0_6 = arith.constant 0 : index
    %c0_7 = arith.constant 0 : index
    %8 = vector.load %arg6[%c0_6, %c0_7] : memref<8x128xf32, #tpu.memory_space<vmem>>, vector<8x128xf32>
    tpu.vector_store %arg6[%c0_6, %c0_7], %7 {strides = array<i32>} : memref<8x128xf32, #tpu.memory_space<vmem>>, vector<8x128xf32>,
    %c0_i32_8 = arith.constant 0 : i32
    %9 = arith.cmpi eq, %arg1, %c0_i32_8 : i32
    %10 = arith.extui %9 : i1 to i32
    %c0_i32_9 = arith.constant 0 : i32
    %11 = arith.cmpi ne, %10, %c0_i32_9 : i32
    scf.if %11 {
      %c0_10 = arith.constant 0 : index
      %c0_11 = arith.constant 0 : index
      %12 = vector.load %arg6[%c0_10, %c0_11] : memref<8x128xf32, #tpu.memory_space<vmem>>, vector<8x128xf32>
      %c0_12 = arith.constant 0 : index
      %c0_13 = arith.constant 0 : index
      %13 = vector.load %arg4[%c0_12, %c0_13] : memref<1x128xf32, #tpu.memory_space<vmem>>, vector<1x128xf32>
      %14 = vector.broadcast %13 : vector<1x128xf32> to vector<8x128xf32>
      %15 = arith.addf %12, %14 : vector<8x128xf32>
      %cst_14 = arith.constant dense<0xFF800000> : vector<8xf32>
      %16 = vector.multi_reduction <maximumf>, %15, %cst_14 [1] : vector<8x128xf32> to vector<8xf32>
      %17 = vector.shape_cast %16 : vector<8xf32> to vector<8x1xf32>
      %18 = vector.broadcast %17 : vector<8x1xf32> to vector<8x128xf32>
      %19 = arith.subf %15, %18 : vector<8x128xf32>
      %20 = math.exp %19 : vector<8x128xf32>
      %cst_15 = arith.constant dense<0.000000e+00> : vector<8xf32>
      %21 = vector.multi_reduction <add>, %20, %cst_15 [1] : vector<8x128xf32> to vector<8xf32>
      %22 = vector.shape_cast %21 : vector<8xf32> to vector<8x1xf32>
      %23 = tpu.reciprocal %22 : vector<8x1xf32> -> vector<8x1xf32>
      %24 = vector.broadcast %23 : vector<8x1xf32> to vector<8x128xf32>
      %25 = arith.mulf %20, %24 : vector<8x128xf32>
      %c0_16 = arith.constant 0 : index
      %c0_17 = arith.constant 0 : index
      %26 = vector.load %arg5[%c0_16, %c0_17] : memref<8x128xf32, #tpu.memory_space<vmem>>, vector<8x128xf32>
      tpu.vector_store %arg5[%c0_16, %c0_17], %25 {strides = array<i32>} : memref<8x128xf32, #tpu.memory_space<vmem>>, vector<8x128xf32>,
    } else {
    }
    return
  }
  func.func @transform_0(%arg0: i32, %arg1: i32) -> (i32, i32) {
    %c0_i32 = arith.constant 0 : i32
    return %arg0, %arg1 : i32, i32
  }
  func.func @transform_1(%arg0: i32, %arg1: i32) -> (i32, i32) {
    %c0_i32 = arith.constant 0 : i32
    %c0_i32_0 = arith.constant 0 : i32
    return %arg1, %c0_i32 : i32, i32
  }
  func.func @transform_2(%arg0: i32, %arg1: i32) -> (i32, i32) {
    %c0_i32 = arith.constant 0 : i32
    %c0_i32_0 = arith.constant 0 : i32
    %c0_i32_1 = arith.constant 0 : i32
    return %c0_i32, %c0_i32_0 : i32, i32
  }
  func.func @transform_3(%arg0: i32, %arg1: i32) -> (i32, i32) {
    %c0_i32 = arith.constant 0 : i32
    %c0_i32_0 = arith.constant 0 : i32
    return %arg0, %c0_i32 : i32, i32
  }
}

</mosaic_0001>

<bundles_post_ra>
// kernel: tpu_custom_call.1
= control target key start
LH: loop header
LB: loop body
LE: loop exit
PB: predicated region body
PF: predicated region fallthrough
CT: control target
= control target key end

     0   :  { %8 = vsyncpa [#allocation4], 0  ;;  %s265_s0 = inlined_call_operand.hbm [shape: f32[8,128], index: 0, kind: input, shape index: {}]   ;;  %s266_s1 = inlined_call_operand.hbm [shape: f32[128,128], index: 1, kind: input, shape index: {}]   ;;  %s267_s2 = inlined_call_operand.vmem [shape: f32[1,128], index: 2, kind: input, shape index: {}]   ;;  %s268_s3 = inlined_call_operand.hbm [shape: f32[8,128], index: 3, kind: output, shape index: {}]  }
   0x1   :  { %9 = vsyncpa [#allocation7], 0 }
   0x2   :  { %10 = vsyncpa [#allocation5], 0  ;;  %s16_s14 = sshll.u32 %s265_s0, 4  ;;  %s228_s15 = smov [#allocation3]   ;;  %s17_s14 = int_to_ptr.hbm [resolvable:$true] %s16_s14 }
   0x3   :  { %s18_s16 = sshll.u32 %s228_s15, 4  ;;  %s26_s19 = sshll.u32 %s266_s1, 4  ;;  %s19_s16 = int_to_ptr.vmem [resolvable:$true] %s18_s16  ;;  %s27_s19 = int_to_ptr.hbm [resolvable:$true] %s26_s19 }
   0x4   :  { %21 = dma.hbm_to_vmem [thread:$0]  %s17_s14, 128, %s19_s16, [#allocation4]  }
   0x5   :  { %s229_s20 = smov [#allocation6]   ;;  %s230_s22 = smov 128  }
   0x6   :  { %s28_s21 = sshll.u32 %s229_s20, 4  ;;  %s231_s23 = smov 8   ;;  %s29_s21 = int_to_ptr.vmem [resolvable:$true] %s28_s21 }
   0x7   :  { %34 = dma.hbm_to_vmem [thread:$0]  %s27_s19, 2048, %s29_s21, [#allocation7], %s230_s22, %s230_s22, %s231_s23  }
   0x8   :  { %222 = dma.done.wait [#allocation4], 128  }
   0x9   :  { %223 = vsyncadd [#allocation4], 4294967168 }
   0xa   :  { %224 = dma.done.wait [#allocation7], 2048  }
   0xb   :  { %225 = vsyncadd [#allocation7], 4294965248  ;;  %v67_v0 = vld [vmem:[#allocation6 + $0x78] sm:$0xff]  ;;  %v66_v1 = vld [vmem:[#allocation6 + $0x70] sm:$0xff]  ;;  %s129_s27 = sshll.u32 %s268_s3, 4  ;;  %s130_s27 = int_to_ptr.hbm [resolvable:$true] %s129_s27 }
   0xc   :  { %68 = vmatpush.msra.mxu0 %v67_v0  ;;  %v65_v2 = vld [vmem:[#allocation6 + $0x68] sm:$0xff]  ;;  %v64_v3 = vld [vmem:[#allocation6 + $0x60] sm:$0xff]  ;;  %v63_v4 = vld [vmem:[#allocation6 + $0x58] sm:$0xff] }
   0xd   :  { %v62_v5 = vld [vmem:[#allocation6 + $0x50] sm:$0xff]  ;;  %v61_v6 = vld [vmem:[#allocation6 + $0x48] sm:$0xff]  ;;  %v60_v7 = vld [vmem:[#allocation6 + $0x40] sm:$0xff] }
   0xe   :  { %69 = vmatpush.msra.mxu0 %v66_v1  ;;  %v59_v8 = vld [vmem:[#allocation6 + $0x38] sm:$0xff]  ;;  %v58_v9 = vld [vmem:[#allocation6 + $0x30] sm:$0xff]  ;;  %v57_v10 = vld [vmem:[#allocation6 + $0x28] sm:$0xff] }
   0xf   :  { %v56_v11 = vld [vmem:[#allocation6 + $0x20] sm:$0xff]  ;;  %v55_v12 = vld [vmem:[#allocation6 + $0x18] sm:$0xff]  ;;  %v54_v13 = vld [vmem:[#allocation6 + $0x10] sm:$0xff] }
  0x10   :  { %70 = vmatpush.msra.mxu0 %v65_v2  ;;  %v53_v14 = vld [vmem:[#allocation6 + $0x8] sm:$0xff]  ;;  %v52_v15 = vld [vmem:[#allocation6] sm:$0xff]  ;;  %v51_v16 = vld [vmem:[#allocation3] sm:$0xff] }
  0x11   :  { %v145_v17 = vld [vmem:[%s267_s2] ss:$0 sm:$0xff]  ;;  %s232_s2 = smov [#allocation8]  }
  0x12   :  { %71 = vmatpush.msra.mxu0 %v64_v3  ;;  %s127_s24 = sshll.u32 %s232_s2, 4  ;;  %s128_s24 = int_to_ptr.vmem [resolvable:$true] %s127_s24 }
  0x14   :  { %72 = vmatpush.msra.mxu0 %v63_v4 }
  0x16   :  { %73 = vmatpush.msra.mxu0 %v62_v5 }
  0x18   :  { %74 = vmatpush.msra.mxu0 %v61_v6 }
  0x1a   :  { %75 = vmatpush.msra.mxu0 %v60_v7 }
  0x1c   :  { %76 = vmatpush.msra.mxu0 %v59_v8 }
  0x1e   :  { %77 = vmatpush.msra.mxu0 %v58_v9 }
  0x20   :  { %78 = vmatpush.msra.mxu0 %v57_v10 }
  0x22   :  { %79 = vmatpush.msra.mxu0 %v56_v11 }
  0x24   :  { %80 = vmatpush.msra.mxu0 %v55_v12 }
  0x26   :  { %81 = vmatpush.msra.mxu0 %v54_v13 }
  0x28   :  { %82 = vmatpush.msra.mxu0 %v53_v14 }
  0x2a   :  { %83 = vmatpush.msra.mxu0 %v52_v15 }
  0x2b   :  { %84 = vmatmul.f32.vlgmr.msra.gmra.mxu0 %v51_v16 }
  0xa8   :  { %v85_v18 = vpop.f32.mrf.mxu0 }
  0xa9   :  { %v98_v19 = vadd.f32 %v145_v17, %v85_v18 }
  0xab   :  { %99 = vmax.xlane.f32.xlu0 %v98_v19 }
 0x11e   :  { %v100_v20 = vpop.xlane.xlu0 %99 }
 0x11f   :  { %v101_v21 = vsub.f32 %v98_v19, %v100_v20 }
 0x121   :  { %v102_v22 = vmul.f32 1.442695, %v101_v21 }
 0x123   :  { %146 = vpow2.f32 %v102_v22 }
 0x129   :  { %v147_v23 = vpop.eup %146 }
 0x12a   :  { %104 = vadd.xlane.f32.xlu0 %v147_v23 }
 0x19d   :  { %v105_v24 = vpop.xlane.xlu0 %104 }
 0x19e   :  { %148 = vrcp.f32 %v105_v24  ;;  %v117_v28 = vand.u32 2147483648, %v105_v24  ;;  %v115_v30 = vand.u32 2147483647, %v105_v24  ;;  %vm111_vm1 = vweird.f32 %v105_v24 }
 0x1a0   :  { %v118_v32 = vor.u32 1.1754944e-38, %v117_v28  ;;  %vm116_vm3 = vcmp.eq.f32.partialorder %v115_v30, 8.507059e+37 }
 0x1a4   :  { %v149_v25 = vpop.eup %148 }
 0x1a5   :  { %v107_v26 = vmul.f32 %v149_v25, %v105_v24  ;;  %vm112_vm0 = vweird.f32 %v149_v25 }
 0x1a6   :  { %vm113_vm2 = vmor %vm111_vm1, %vm112_vm0 }
 0x1a7   :  { %v108_v27 = vsub.f32 1.0, %v107_v26 }
 0x1a9   :  { %v109_v29 = vmul.f32 %v149_v25, %v108_v27 }
 0x1ab   :  { %v110_v31 = vadd.f32 %v149_v25, %v109_v29 }
 0x1ad   :  { %v114_v33 = vsel %vm113_vm2, %v149_v25, %v110_v31 }
 0x1ae   :  { %v119_v34 = vsel %vm116_vm3, %v118_v32, %v114_v33 }
 0x1af   :  { %v120_v35 = vmul.f32 %v147_v23, %v119_v34 }
 0x1b1   :  { %121 = vst [vmem:[#allocation8] sm:$0xff] %v120_v35 }
 0x1b2   :  { %132 = dma.vmem_to_hbm [thread:$0]  %s128_s24, 128, %s130_s27, [#allocation5]  }
 0x1b3   :  { %226 = dma.done.wait [#allocation5], 128  }
 0x1b4   :  { %227 = vsyncadd [#allocation5], 4294967168 }
 0x1b5   :  { %137 = vsyncpa [#allocation4], 1 }
 0x1b6   :  { %138 = vsyncpa [#allocation7], 1 }
 0x1b7   :  { %139 = vsyncpa [#allocation5], 1 }

// kernel: tpu_custom_call.1
= control target key start
LH: loop header
LB: loop body
LE: loop exit
PB: predicated region body
PF: predicated region fallthrough
CT: control target
= control target key end

     0   :  { %8 = vsyncpa [#allocation4], 0  ;;  %s265_s0 = inlined_call_operand.hbm [shape: f32[8,128], index: 0, kind: input, shape index: {}]   ;;  %s266_s1 = inlined_call_operand.hbm [shape: f32[128,128], index: 1, kind: input, shape index: {}]   ;;  %s267_s2 = inlined_call_operand.vmem [shape: f32[1,128], index: 2, kind: input, shape index: {}]   ;;  %s268_s3 = inlined_call_operand.hbm [shape: f32[8,128], index: 3, kind: output, shape index: {}]  }
   0x1   :  { %9 = vsyncpa [#allocation7], 0 }
   0x2   :  { %10 = vsyncpa [#allocation5], 0  ;;  %s16_s14 = sshll.u32 %s265_s0, 4  ;;  %s228_s15 = smov [#allocation3]   ;;  %s17_s14 = int_to_ptr.hbm [resolvable:$true] %s16_s14 }
   0x3   :  { %s18_s16 = sshll.u32 %s228_s15, 4  ;;  %s26_s19 = sshll.u32 %s266_s1, 4  ;;  %s19_s16 = int_to_ptr.vmem [resolvable:$true] %s18_s16  ;;  %s27_s19 = int_to_ptr.hbm [resolvable:$true] %s26_s19 }
   0x4   :  { %21 = dma.hbm_to_vmem [thread:$0]  %s17_s14, 128, %s19_s16, [#allocation4]  }
   0x5   :  { %s229_s20 = smov [#allocation6]   ;;  %s230_s22 = smov 128  }
   0x6   :  { %s28_s21 = sshll.u32 %s229_s20, 4  ;;  %s231_s23 = smov 8   ;;  %s29_s21 = int_to_ptr.vmem [resolvable:$true] %s28_s21 }
   0x7   :  { %34 = dma.hbm_to_vmem [thread:$0]  %s27_s19, 2048, %s29_s21, [#allocation7], %s230_s22, %s230_s22, %s231_s23  }
   0x8   :  { %222 = dma.done.wait [#allocation4], 128  }
   0x9   :  { %223 = vsyncadd [#allocation4], 4294967168 }
   0xa   :  { %224 = dma.done.wait [#allocation7], 2048  }
   0xb   :  { %225 = vsyncadd [#allocation7], 4294965248  ;;  %v67_v0 = vld [vmem:[#allocation6 + $0x78] sm:$0xff]  ;;  %v66_v1 = vld [vmem:[#allocation6 + $0x70] sm:$0xff]  ;;  %s129_s27 = sshll.u32 %s268_s3, 4  ;;  %s130_s27 = int_to_ptr.hbm [resolvable:$true] %s129_s27 }
   0xc   :  { %68 = vmatpush.msra.mxu0 %v67_v0  ;;  %v65_v2 = vld [vmem:[#allocation6 + $0x68] sm:$0xff]  ;;  %v64_v3 = vld [vmem:[#allocation6 + $0x60] sm:$0xff]  ;;  %v63_v4 = vld [vmem:[#allocation6 + $0x58] sm:$0xff] }
   0xd   :  { %v62_v5 = vld [vmem:[#allocation6 + $0x50] sm:$0xff]  ;;  %v61_v6 = vld [vmem:[#allocation6 + $0x48] sm:$0xff]  ;;  %v60_v7 = vld [vmem:[#allocation6 + $0x40] sm:$0xff] }
   0xe   :  { %69 = vmatpush.msra.mxu0 %v66_v1  ;;  %v59_v8 = vld [vmem:[#allocation6 + $0x38] sm:$0xff]  ;;  %v58_v9 = vld [vmem:[#allocation6 + $0x30] sm:$0xff]  ;;  %v57_v10 = vld [vmem:[#allocation6 + $0x28] sm:$0xff] }
   0xf   :  { %v56_v11 = vld [vmem:[#allocation6 + $0x20] sm:$0xff]  ;;  %v55_v12 = vld [vmem:[#allocation6 + $0x18] sm:$0xff]  ;;  %v54_v13 = vld [vmem:[#allocation6 + $0x10] sm:$0xff] }
  0x10   :  { %70 = vmatpush.msra.mxu0 %v65_v2  ;;  %v53_v14 = vld [vmem:[#allocation6 + $0x8] sm:$0xff]  ;;  %v52_v15 = vld [vmem:[#allocation6] sm:$0xff]  ;;  %v51_v16 = vld [vmem:[#allocation3] sm:$0xff] }
  0x11   :  { %v145_v17 = vld [vmem:[%s267_s2] ss:$0 sm:$0xff]  ;;  %s232_s2 = smov [#allocation8]  }
  0x12   :  { %71 = vmatpush.msra.mxu0 %v64_v3  ;;  %s127_s24 = sshll.u32 %s232_s2, 4  ;;  %s128_s24 = int_to_ptr.vmem [resolvable:$true] %s127_s24 }
  0x14   :  { %72 = vmatpush.msra.mxu0 %v63_v4 }
  0x16   :  { %73 = vmatpush.msra.mxu0 %v62_v5 }
  0x18   :  { %74 = vmatpush.msra.mxu0 %v61_v6 }
  0x1a   :  { %75 = vmatpush.msra.mxu0 %v60_v7 }
  0x1c   :  { %76 = vmatpush.msra.mxu0 %v59_v8 }
  0x1e   :  { %77 = vmatpush.msra.mxu0 %v58_v9 }
  0x20   :  { %78 = vmatpush.msra.mxu0 %v57_v10 }
  0x22   :  { %79 = vmatpush.msra.mxu0 %v56_v11 }
  0x24   :  { %80 = vmatpush.msra.mxu0 %v55_v12 }
  0x26   :  { %81 = vmatpush.msra.mxu0 %v54_v13 }
  0x28   :  { %82 = vmatpush.msra.mxu0 %v53_v14 }
  0x2a   :  { %83 = vmatpush.msra.mxu0 %v52_v15 }
  0x2b   :  { %84 = vmatmul.f32.vlgmr.msra.gmra.mxu0 %v51_v16 }
  0xa8   :  { %v85_v18 = vpop.f32.mrf.mxu0 }
  0xa9   :  { %v98_v19 = vadd.f32 %v145_v17, %v85_v18 }
  0xab   :  { %99 = vmax.xlane.f32.xlu0 %v98_v19 }
 0x11e   :  { %v100_v20 = vpop.xlane.xlu0 %99 }
 0x11f   :  { %v101_v21 = vsub.f32 %v98_v19, %v100_v20 }
 0x121   :  { %v102_v22 = vmul.f32 1.442695, %v101_v21 }
 0x123   :  { %146 = vpow2.f32 %v102_v22 }
 0x129   :  { %v147_v23 = vpop.eup %146 }
 0x12a   :  { %104 = vadd.xlane.f32.xlu0 %v147_v23 }
 0x19d   :  { %v105_v24 = vpop.xlane.xlu0 %104 }
 0x19e   :  { %148 = vrcp.f32 %v105_v24  ;;  %v117_v28 = vand.u32 2147483648, %v105_v24  ;;  %v115_v30 = vand.u32 2147483647, %v105_v24  ;;  %vm111_vm1 = vweird.f32 %v105_v24 }
 0x1a0   :  { %v118_v32 = vor.u32 1.1754944e-38, %v117_v28  ;;  %vm116_vm3 = vcmp.eq.f32.partialorder %v115_v30, 8.507059e+37 }
 0x1a4   :  { %v149_v25 = vpop.eup %148 }
 0x1a5   :  { %v107_v26 = vmul.f32 %v149_v25, %v105_v24  ;;  %vm112_vm0 = vweird.f32 %v149_v25 }
 0x1a6   :  { %vm113_vm2 = vmor %vm111_vm1, %vm112_vm0 }
 0x1a7   :  { %v108_v27 = vsub.f32 1.0, %v107_v26 }
 0x1a9   :  { %v109_v29 = vmul.f32 %v149_v25, %v108_v27 }
 0x1ab   :  { %v110_v31 = vadd.f32 %v149_v25, %v109_v29 }
 0x1ad   :  { %v114_v33 = vsel %vm113_vm2, %v149_v25, %v110_v31 }
 0x1ae   :  { %v119_v34 = vsel %vm116_vm3, %v118_v32, %v114_v33 }
 0x1af   :  { %v120_v35 = vmul.f32 %v147_v23, %v119_v34 }
 0x1b1   :  { %121 = vst [vmem:[#allocation8] sm:$0xff] %v120_v35 }
 0x1b2   :  { %132 = dma.vmem_to_hbm [thread:$0]  %s128_s24, 128, %s130_s27, [#allocation5]  }
 0x1b3   :  { %226 = dma.done.wait [#allocation5], 128  }
 0x1b4   :  { %227 = vsyncadd [#allocation5], 4294967168 }
 0x1b5   :  { %137 = vsyncpa [#allocation4], 1 }
 0x1b6   :  { %138 = vsyncpa [#allocation7], 1 }
 0x1b7   :  { %139 = vsyncpa [#allocation5], 1 }

</bundles_post_ra>
